<compile_context>
chip_gen: v6e
topology: v6e:2x2x1
jax: 0.10.0
libtpu: 0.0.40
codegen_flags: <defaults>
</compile_context>

<pallas_src>
import functools
import math

import jax
import jax.numpy as jnp
from jax.experimental import pallas as pl
from jax.experimental.pallas import tpu as pltpu

_LANES = 128
_MAX_TILE_ROWS = 6144  # (6144, 128) f32 = 3 MiB per block; in+out double-buffered = 12 MiB.


def _fmix32(x):
    """32-bit murmur3-style finalizer (bijective mix) on uint32 data."""
    x = x ^ (x >> 16)
    x = x * jnp.uint32(0x7FEB352D)
    x = x ^ (x >> 15)
    x = x * jnp.uint32(0x846CA68B)
    x = x ^ (x >> 16)
    return x


def _to_u32(bits):
    if bits.dtype == jnp.uint32:
        return bits
    return jax.lax.bitcast_convert_type(bits, jnp.uint32)


def _unit_float(bits):
    """uint32 random bits -> uniform f32 in [0, 1) via the mantissa-fill trick."""
    mant = (bits >> 9) | jnp.uint32(0x3F800000)  # float in [1, 2)
    return jax.lax.bitcast_convert_type(mant, jnp.float32) - 1.0


def gaussian_noise_kernel(seed_ref, x_ref, o_ref, *, sigma, use_hw_prng):
    tile_r, lanes = x_ref.shape
    half = (tile_r + 1) // 2          # Box-Muller: one pair of normals per draw
    rest = tile_r - half

    i = pl.program_id(0)

    if use_hw_prng:
        # Per-tile seeding depends only on (seed, tile index) -> distinct,
        # deterministic streams across tiles and across v7x cores.
        pltpu.prng_seed(seed_ref[0], i)
        b1 = _to_u32(pltpu.prng_random_bits((half, lanes)))
        b2 = _to_u32(pltpu.prng_random_bits((half, lanes)))
    else:
        # Counter-hash fallback (interpret mode / non-TPU backends).
        row = jax.lax.broadcasted_iota(jnp.int32, (half, lanes), 0)
        col = jax.lax.broadcasted_iota(jnp.int32, (half, lanes), 1)
        idx = (i * half + row) * lanes + col  # NOTE: int32 counter; wraps past 2^31 elems.
        ctr = jax.lax.bitcast_convert_type(idx, jnp.uint32)
        seed_u = jax.lax.bitcast_convert_type(seed_ref[0], jnp.uint32)
        s1 = _fmix32(seed_u ^ jnp.uint32(0x9E3779B9))
        s2 = _fmix32(seed_u + jnp.uint32(0x85EBCA6B))
        b1 = _fmix32(ctr ^ s1)
        b2 = _fmix32(ctr ^ s2)

    # Uniforms (mantissa trick uses the top 23 bits; bit 0 of b2 stays free for
    # the sign draw below).  Clamping u1 truncates the normal at ~5.6 sigma,
    # which is negligible for noise injection.
    u1 = jnp.maximum(_unit_float(b1), jnp.float32(1e-7))
    u2 = _unit_float(b2)

    # Box-Muller with sigma folded into the radius.  Only ONE trig call: the
    # sin branch is sign * sqrt(1 - cos^2) with an independent random sign,
    # which has exactly the same joint distribution.
    r = jnp.sqrt(jnp.float32(-2.0) * jnp.log(u1)) * jnp.float32(sigma)
    theta = jnp.float32(2.0 * math.pi) * u2
    c = jnp.cos(theta)
    s_mag = jnp.sqrt(jnp.maximum(jnp.float32(1.0) - c * c, jnp.float32(0.0)))
    sign = jnp.where((b2 & jnp.uint32(1)) == 0, jnp.float32(1.0), jnp.float32(-1.0))

    z1 = r * c
    z2 = (r * sign) * s_mag

    # Add in f32, single cast at each store; no concatenate temporary.
    o_ref[:half] = (x_ref[:half].astype(jnp.float32) + z1).astype(o_ref.dtype)
    if rest > 0:
        o_ref[half:] = (x_ref[half:].astype(jnp.float32) + z2[:rest]).astype(o_ref.dtype)


def gaussian_noise(x, sigma=None, seed=0, use_hw_prng=None):
    """Pallas equivalent of GaussianNoise.forward."""
    if sigma is None:
        return x  # identity path, exactly like the PyTorch module

    if use_hw_prng is None:
        use_hw_prng = jax.default_backend() == "tpu"

    orig_shape = x.shape
    orig_dtype = x.dtype
    n = x.size
    itemsize = jnp.dtype(orig_dtype).itemsize

    flat = x.reshape(-1)
    padded = pl.cdiv(n, _LANES) * _LANES  # lane-row alignment only
    if padded != n:
        # TODO(synk): ragged tail pays one extra HBM pad/slice pass; any size
        # that is a multiple of 128 elements skips it entirely.
        flat = jnp.pad(flat, (0, padded - n))
    rows = padded // _LANES
    x2d = flat.reshape(rows, _LANES)

    tile_r = min(_MAX_TILE_ROWS, rows)
    grid = (pl.cdiv(rows, tile_r),)

    seed_arr = jnp.array([seed], dtype=jnp.int32)

    cost = pl.CostEstimate(
        flops=10 * n,
        transcendentals=2 * n,
        bytes_accessed=2 * n * itemsize,
    )

    out2d = pl.pallas_call(
        functools.partial(gaussian_noise_kernel, sigma=float(sigma),
                          use_hw_prng=use_hw_prng),
        out_shape=jax.ShapeDtypeStruct((rows, _LANES), orig_dtype),
        grid_spec=pltpu.PrefetchScalarGridSpec(
            num_scalar_prefetch=1,
            grid=grid,
            in_specs=[pl.BlockSpec((tile_r, _LANES), lambda i, seed: (i, 0))],
            out_specs=pl.BlockSpec((tile_r, _LANES), lambda i, seed: (i, 0)),
        ),
        compiler_params=pltpu.CompilerParams(
            dimension_semantics=("parallel",),
            vmem_limit_bytes=48 * 1024 * 1024,
        ),
        cost_estimate=cost,
    )(seed_arr, x2d)

    out = out2d.reshape(-1)
    if padded != n:
        out = out[:n]
    return out.reshape(orig_shape)


if __name__ == "__main__":
    key = jax.random.PRNGKey(0)
    # Small NCHW input, as a classifier embedding-net would see.
    x = jax.random.normal(key, (2, 4, 16, 16), dtype=jnp.float32)

    sigma = 0.1
    y = gaussian_noise(x, sigma=sigma, seed=1234)
    y = jax.block_until_ready(y)

    # Sanity checks: shape/dtype preserved, noise actually added, noise scale
    # roughly matches sigma.
    assert y.shape == x.shape and y.dtype == x.dtype
    diff = y - x
    assert float(jnp.max(jnp.abs(diff))) > 0.0
    std = float(jnp.std(diff))
    assert 0.03 < std < 0.3, f"noise std {std} inconsistent with sigma={sigma}"
    mean = float(jnp.mean(diff))
    assert abs(mean) < 0.05, f"noise mean {mean} not near zero"

    # Different seeds give different noise; same seed is reproducible.
    y2 = jax.block_until_ready(gaussian_noise(x, sigma=sigma, seed=999))
    assert float(jnp.max(jnp.abs(y2 - y))) > 0.0
    y3 = jax.block_until_ready(gaussian_noise(x, sigma=sigma, seed=1234))
    assert bool(jnp.all(y3 == y))

    # sigma=None path is the identity.
    y_id = jax.block_until_ready(gaussian_noise(x, sigma=None))
    assert bool(jnp.all(y_id == x))

    # Non-aligned size exercises the padded / ragged path.
    x_odd = jax.random.normal(jax.random.PRNGKey(1), (3, 5, 7), dtype=jnp.float32)
    y_odd = jax.block_until_ready(gaussian_noise(x_odd, sigma=sigma, seed=7))
    assert y_odd.shape == x_odd.shape
    assert float(jnp.max(jnp.abs(y_odd - x_odd))) > 0.0

    print("KERNEL_OK")
</pallas_src>

<mosaic_0001>
module attributes {stable_mosaic.version = 11 : i64} {
  func.func @gaussian_noise_kernel(%arg0: i32, %arg1: memref<1xi32, #tpu.memory_space<smem>>, %arg2: memref<16x128xf32, #tpu.memory_space<vmem>>, %arg3: memref<16x128xf32, #tpu.memory_space<vmem>>) attributes {dimension_semantics = [#tpu.dimension_semantics<parallel>], iteration_bounds = array<i64: 1>, scalar_prefetch = 1 : i64, scratch_operands = 0 : i64, tpu.core_type = #tpu.core_type<tc>, window_params = [{transform_indices = @transform_0, window_bounds = array<i64: 16, 128>}, {transform_indices = @transform_1, window_bounds = array<i64: 16, 128>}]} {
    %0 = tpu.iota {dimensions = array<i32: 0>} : vector<8x128xi32>
    %1 = tpu.iota {dimensions = array<i32: 1>} : vector<8x128xi32>
    %c8_i32 = arith.constant 8 : i32
    %2 = arith.muli %arg0, %c8_i32 : i32
    %3 = vector.broadcast %2 : i32 to vector<8x128xi32>
    %4 = arith.addi %3, %0 : vector<8x128xi32>
    %c128_i32 = arith.constant 128 : i32
    %5 = vector.broadcast %c128_i32 : i32 to vector<8x128xi32>
    %6 = arith.muli %4, %5 : vector<8x128xi32>
    %7 = arith.addi %6, %1 : vector<8x128xi32>
    %8 = tpu.bitcast %7 : vector<8x128xi32> -> vector<8x128xi32>
    %c0 = arith.constant 0 : index
    %9 = memref.load %arg1[%c0] : memref<1xi32, #tpu.memory_space<smem>>
    %10 = arith.bitcast %9 : i32 to i32
    %c-1640531527_i32 = arith.constant -1640531527 : i32
    %11 = arith.xori %10, %c-1640531527_i32 : i32
    %c16_i32 = arith.constant 16 : i32
    %12 = arith.shrui %11, %c16_i32 : i32
    %13 = arith.xori %11, %12 : i32
    %c2146121005_i32 = arith.constant 2146121005 : i32
    %14 = arith.muli %13, %c2146121005_i32 : i32
    %c15_i32 = arith.constant 15 : i32
    %15 = arith.shrui %14, %c15_i32 : i32
    %16 = arith.xori %14, %15 : i32
    %c-2073254261_i32 = arith.constant -2073254261 : i32
    %17 = arith.muli %16, %c-2073254261_i32 : i32
    %c16_i32_0 = arith.constant 16 : i32
    %18 = arith.shrui %17, %c16_i32_0 : i32
    %19 = arith.xori %17, %18 : i32
    %c-2048144789_i32 = arith.constant -2048144789 : i32
    %20 = arith.addi %10, %c-2048144789_i32 : i32
    %c16_i32_1 = arith.constant 16 : i32
    %21 = arith.shrui %20, %c16_i32_1 : i32
    %22 = arith.xori %20, %21 : i32
    %c2146121005_i32_2 = arith.constant 2146121005 : i32
    %23 = arith.muli %22, %c2146121005_i32_2 : i32
    %c15_i32_3 = arith.constant 15 : i32
    %24 = arith.shrui %23, %c15_i32_3 : i32
    %25 = arith.xori %23, %24 : i32
    %c-2073254261_i32_4 = arith.constant -2073254261 : i32
    %26 = arith.muli %25, %c-2073254261_i32_4 : i32
    %c16_i32_5 = arith.constant 16 : i32
    %27 = arith.shrui %26, %c16_i32_5 : i32
    %28 = arith.xori %26, %27 : i32
    %29 = vector.broadcast %19 : i32 to vector<8x128xi32>
    %30 = arith.xori %8, %29 : vector<8x128xi32>
    %c16_i32_6 = arith.constant 16 : i32
    %31 = vector.broadcast %c16_i32_6 : i32 to vector<8x128xi32>
    %32 = arith.shrui %30, %31 : vector<8x128xi32>
    %33 = arith.xori %30, %32 : vector<8x128xi32>
    %c2146121005_i32_7 = arith.constant 2146121005 : i32
    %34 = vector.broadcast %c2146121005_i32_7 : i32 to vector<8x128xi32>
    %35 = arith.muli %33, %34 : vector<8x128xi32>
    %c15_i32_8 = arith.constant 15 : i32
    %36 = vector.broadcast %c15_i32_8 : i32 to vector<8x128xi32>
    %37 = arith.shrui %35, %36 : vector<8x128xi32>
    %38 = arith.xori %35, %37 : vector<8x128xi32>
    %c-2073254261_i32_9 = arith.constant -2073254261 : i32
    %39 = vector.broadcast %c-2073254261_i32_9 : i32 to vector<8x128xi32>
    %40 = arith.muli %38, %39 : vector<8x128xi32>
    %c16_i32_10 = arith.constant 16 : i32
    %41 = vector.broadcast %c16_i32_10 : i32 to vector<8x128xi32>
    %42 = arith.shrui %40, %41 : vector<8x128xi32>
    %43 = arith.xori %40, %42 : vector<8x128xi32>
    %44 = vector.broadcast %28 : i32 to vector<8x128xi32>
    %45 = arith.xori %8, %44 : vector<8x128xi32>
    %c16_i32_11 = arith.constant 16 : i32
    %46 = vector.broadcast %c16_i32_11 : i32 to vector<8x128xi32>
    %47 = arith.shrui %45, %46 : vector<8x128xi32>
    %48 = arith.xori %45, %47 : vector<8x128xi32>
    %c2146121005_i32_12 = arith.constant 2146121005 : i32
    %49 = vector.broadcast %c2146121005_i32_12 : i32 to vector<8x128xi32>
    %50 = arith.muli %48, %49 : vector<8x128xi32>
    %c15_i32_13 = arith.constant 15 : i32
    %51 = vector.broadcast %c15_i32_13 : i32 to vector<8x128xi32>
    %52 = arith.shrui %50, %51 : vector<8x128xi32>
    %53 = arith.xori %50, %52 : vector<8x128xi32>
    %c-2073254261_i32_14 = arith.constant -2073254261 : i32
    %54 = vector.broadcast %c-2073254261_i32_14 : i32 to vector<8x128xi32>
    %55 = arith.muli %53, %54 : vector<8x128xi32>
    %c16_i32_15 = arith.constant 16 : i32
    %56 = vector.broadcast %c16_i32_15 : i32 to vector<8x128xi32>
    %57 = arith.shrui %55, %56 : vector<8x128xi32>
    %58 = arith.xori %55, %57 : vector<8x128xi32>
    %c9_i32 = arith.constant 9 : i32
    %59 = vector.broadcast %c9_i32 : i32 to vector<8x128xi32>
    %60 = arith.shrui %43, %59 : vector<8x128xi32>
    %c1065353216_i32 = arith.constant 1065353216 : i32
    %61 = vector.broadcast %c1065353216_i32 : i32 to vector<8x128xi32>
    %62 = arith.ori %60, %61 : vector<8x128xi32>
    %63 = tpu.bitcast %62 : vector<8x128xi32> -> vector<8x128xf32>
    %cst = arith.constant 1.000000e+00 : f32
    %64 = vector.broadcast %cst : f32 to vector<8x128xf32>
    %65 = arith.subf %63, %64 : vector<8x128xf32>
    %cst_16 = arith.constant 1.000000e-07 : f32
    %66 = vector.broadcast %cst_16 : f32 to vector<8x128xf32>
    %67 = arith.maximumf %65, %66 : vector<8x128xf32>
    %c9_i32_17 = arith.constant 9 : i32
    %68 = vector.broadcast %c9_i32_17 : i32 to vector<8x128xi32>
    %69 = arith.shrui %58, %68 : vector<8x128xi32>
    %c1065353216_i32_18 = arith.constant 1065353216 : i32
    %70 = vector.broadcast %c1065353216_i32_18 : i32 to vector<8x128xi32>
    %71 = arith.ori %69, %70 : vector<8x128xi32>
    %72 = tpu.bitcast %71 : vector<8x128xi32> -> vector<8x128xf32>
    %cst_19 = arith.constant 1.000000e+00 : f32
    %73 = vector.broadcast %cst_19 : f32 to vector<8x128xf32>
    %74 = arith.subf %72, %73 : vector<8x128xf32>
    %75 = math.log %67 : vector<8x128xf32>
    %cst_20 = arith.constant -2.000000e+00 : f32
    %76 = vector.broadcast %cst_20 : f32 to vector<8x128xf32>
    %77 = arith.mulf %76, %75 : vector<8x128xf32>
    %78 = math.sqrt %77 : vector<8x128xf32>
    %cst_21 = arith.constant 1.000000e-01 : f32
    %79 = vector.broadcast %cst_21 : f32 to vector<8x128xf32>
    %80 = arith.mulf %78, %79 : vector<8x128xf32>
    %cst_22 = arith.constant 6.28318548 : f32
    %81 = vector.broadcast %cst_22 : f32 to vector<8x128xf32>
    %82 = arith.mulf %81, %74 : vector<8x128xf32>
    %83 = math.cos %82 : vector<8x128xf32>
    %84 = arith.mulf %83, %83 : vector<8x128xf32>
    %cst_23 = arith.constant 1.000000e+00 : f32
    %85 = vector.broadcast %cst_23 : f32 to vector<8x128xf32>
    %86 = arith.subf %85, %84 : vector<8x128xf32>
    %cst_24 = arith.constant 0.000000e+00 : f32
    %87 = vector.broadcast %cst_24 : f32 to vector<8x128xf32>
    %88 = arith.maximumf %86, %87 : vector<8x128xf32>
    %89 = math.sqrt %88 : vector<8x128xf32>
    %c1_i32 = arith.constant 1 : i32
    %90 = vector.broadcast %c1_i32 : i32 to vector<8x128xi32>
    %91 = arith.andi %58, %90 : vector<8x128xi32>
    %c0_i32 = arith.constant 0 : i32
    %92 = vector.broadcast %c0_i32 : i32 to vector<8x128xi32>
    %93 = arith.cmpi eq, %91, %92 : vector<8x128xi32>
    %cst_25 = arith.constant 1.000000e+00 : f32
    %cst_26 = arith.constant -1.000000e+00 : f32
    %94 = vector.broadcast %cst_25 : f32 to vector<8x128xf32>
    %95 = vector.broadcast %cst_26 : f32 to vector<8x128xf32>
    %96 = arith.select %93, %94, %95 : vector<8x128xi1>, vector<8x128xf32>
    %97 = arith.mulf %80, %83 : vector<8x128xf32>
    %98 = arith.mulf %80, %96 : vector<8x128xf32>
    %99 = arith.mulf %98, %89 : vector<8x128xf32>
    %c0_27 = arith.constant 0 : index
    %c0_28 = arith.constant 0 : index
    %100 = vector.load %arg2[%c0_27, %c0_28] : memref<16x128xf32, #tpu.memory_space<vmem>>, vector<8x128xf32>
    %101 = arith.addf %100, %97 : vector<8x128xf32>
    %c0_29 = arith.constant 0 : index
    %c0_30 = arith.constant 0 : index
    %102 = vector.load %arg3[%c0_29, %c0_30] : memref<16x128xf32, #tpu.memory_space<vmem>>, vector<8x128xf32>
    tpu.vector_store %arg3[%c0_29, %c0_30], %101 {strides = array<i32>} : memref<16x128xf32, #tpu.memory_space<vmem>>, vector<8x128xf32>,
    %c8 = arith.constant 8 : index
    %c0_31 = arith.constant 0 : index
    %103 = vector.load %arg2[%c8, %c0_31] : memref<16x128xf32, #tpu.memory_space<vmem>>, vector<8x128xf32>
    %104 = arith.addf %103, %99 : vector<8x128xf32>
    %c8_32 = arith.constant 8 : index
    %c0_33 = arith.constant 0 : index
    %105 = vector.load %arg3[%c8_32, %c0_33] : memref<16x128xf32, #tpu.memory_space<vmem>>, vector<8x128xf32>
    tpu.vector_store %arg3[%c8_32, %c0_33], %104 {strides = array<i32>} : memref<16x128xf32, #tpu.memory_space<vmem>>, vector<8x128xf32>,
    return
  }
  func.func @transform_0(%arg0: i32, %arg1: memref<1xi32, #tpu.memory_space<smem>>) -> (i32, i32) {
    %c0_i32 = arith.constant 0 : i32
    %c0_i32_0 = arith.constant 0 : i32
    return %arg0, %c0_i32 : i32, i32
  }
  func.func @transform_1(%arg0: i32, %arg1: memref<1xi32, #tpu.memory_space<smem>>) -> (i32, i32) {
    %c0_i32 = arith.constant 0 : i32
    %c0_i32_0 = arith.constant 0 : i32
    return %arg0, %c0_i32 : i32, i32
  }
}

</mosaic_0001>

<bundles_post_ra>
// kernel: tpu_custom_call.1
= control target key start
LH: loop header
LB: loop body
LE: loop exit
PB: predicated region body
PF: predicated region fallthrough
CT: control target
= control target key end

     0   :  { %8 = vsyncpa [#allocation5], 0  ;;  %s383_s0 = inlined_call_operand.<no memory space> [shape: s32[1], index: 0, kind: input, shape index: {}]   ;;  %s384_s1 = inlined_call_operand.hbm [shape: f32[16,128], index: 1, kind: input, shape index: {}]   ;;  %s385_s2 = inlined_call_operand.hbm [shape: f32[16,128], index: 2, kind: output, shape index: {}]  }
   0x1   :  { %9 = vsyncpa [#allocation6], 0  ;;  %s311_s9 = smov [#allocation4]  }
   0x2   :  { %s15_s10 = sshll.u32 %s311_s9, 4  ;;  %s16_s10 = int_to_ptr.vmem [resolvable:$true] %s15_s10 }
   0x3   :  { %s275_s11 = scalar_lea.vmem %s16_s10, 256  ;;  %p280_p1 = scmp.lt.s32.totalorder %s16_s10, %s16_s10 }
   0x4   :  { %p276_p0 = scmp.ne.s32.totalorder %s16_s10, %s275_s11  ;;  %p281_p2 = scmp.lt.s32.totalorder %s275_s11, %s275_s11 }
   0x6   :  { %p282_p3 = por %p281_p2, %p280_p1 }
   0x8   :  { %p283_p4 = pnand %p282_p3, %p276_p0 }
   0xa   :  { %286 = shalt.err (!%p283_p4)
}
   0xb   :  { %s312_s12 = smov 128   ;;  %s313_s13 = smov 8  }
   0xc   :  { %21 = dma.hbm_to_vmem [thread:$0]  %s384_s1, 256, %s16_s10, [#allocation5], %s312_s12, %s312_s12, %s313_s13  }
   0xd   :  { %307 = dma.done.wait [#allocation5], 256  }
   0xe   :  { %308 = vsyncadd [#allocation5], 4294967040  ;;  %v25_v0 = vlaneseq  ;;  %s35_s18 = sxor.u32 2654435769, %s383_s0  ;;  %s44_s21 = sadd.s32 2246822507, %s383_s0 }
   0xf   :  { %s36_s22 = sshrl.u32 %s35_s18, 16  ;;  %s45_s23 = sshrl.u32 %s44_s21, 16  ;;  %v314_v38 = vmov 683565275   ;;  %v315_v40 = vmov 2475754826  }
  0x10   :  { %v26_v1 = vshrl.u32 %v25_v0, 7  ;;  %s37_s24 = sxor.u32 %s36_s22, %s35_s18  ;;  %s46_s25 = sxor.u32 %s45_s23, %s44_s21  ;;  %v28_v2 = vand.u32 127, %v25_v0  ;;  %v316_v42 = vmov 2131351028   ;;  %v317_v46 = vmov 2102212464  }
  0x11   :  { %s38_s26 = smul.u32 2146121005, %s37_s24  ;;  %v318_v51 = vmov 920167782   ;;  %v319_v55 = vmov 1326507024  }
  0x12   :  { %s47_s27 = smul.u32 2146121005, %s46_s25  ;;  %v32_v3 = vmul.u32 128, %v26_v1  ;;  %s321_s8 = smov [#allocation7]  }
  0x13   :  { %s39_s1 = sshrl.u32 %s38_s26, 15  ;;  %s224_s9 = sshll.u32 %s321_s8, 4  ;;  %s225_s9 = int_to_ptr.vmem [resolvable:$true] %s224_s9 }
  0x14   :  { %s40_s28 = sxor.u32 %s39_s1, %s38_s26  ;;  %s48_s29 = sshrl.u32 %s47_s27, 15  ;;  %v33_v4 = vadd.s32 %v32_v3, %v28_v2 }
  0x15   :  { %s41_s30 = smul.u32 2221713035, %s40_s28  ;;  %s49_s3 = sxor.u32 %s48_s29, %s47_s27 }
  0x16   :  { %s50_s4 = smul.u32 2221713035, %s49_s3  ;;  %s287_s10 = scalar_lea.vmem %s225_s9, 256 }
  0x17   :  { %s42_s6 = sshrl.u32 %s41_s30, 16  ;;  %p288_p5 = scmp.ne.s32.totalorder %s225_s9, %s287_s10 }
  0x18   :  { %s51_s5 = sshrl.u32 %s50_s4, 16  ;;  %s43_s0 = sxor.u32 %s42_s6, %s41_s30 }
  0x19   :  { %s52_s7 = sxor.u32 %s51_s5, %s50_s4  ;;  %v53_v8 = vstv %s43_s0  ;;  %p292_p6 = scmp.lt.s32.totalorder %s225_s9, %s225_s9 }
  0x1a   :  { %v63_v5 = vstv %s52_s7  ;;  %v54_v11 = vxor.u32 %v53_v8, %v33_v4  ;;  %p293_p7 = scmp.lt.s32.totalorder %s287_s10, %s287_s10 }
  0x1b   :  { %v64_v6 = vxor.u32 %v63_v5, %v33_v4 }
  0x1c   :  { %v55_v14 = vshrl.u32 %v54_v11, 16  ;;  %p294_p8 = por %p293_p7, %p292_p6 }
  0x1d   :  { %v65_v7 = vshrl.u32 %v64_v6, 16 }
  0x1e   :  { %v56_v17 = vxor.u32 %v55_v14, %v54_v11  ;;  %p295_p9 = pnand %p294_p8, %p288_p5 }
  0x1f   :  { %v66_v9 = vxor.u32 %v65_v7, %v64_v6 }
  0x20   :  { %v57_v20 = vmul.u32 2146121005, %v56_v17 }
  0x21   :  { %v67_v10 = vmul.u32 2146121005, %v66_v9 }
  0x22   :  { %v58_v23 = vshrl.u32 %v57_v20, 15 }
  0x23   :  { %v68_v12 = vshrl.u32 %v67_v10, 15 }
  0x24   :  { %v59_v26 = vxor.u32 %v58_v23, %v57_v20 }
  0x25   :  { %v69_v13 = vxor.u32 %v68_v12, %v67_v10 }
  0x26   :  { %v60_v29 = vmul.u32 2221713035, %v59_v26 }
  0x27   :  { %v70_v15 = vmul.u32 2221713035, %v69_v13 }
  0x28   :  { %v61_v32 = vshrl.u32 %v60_v29, 16 }
  0x29   :  { %v71_v16 = vshrl.u32 %v70_v15, 16 }
  0x2a   :  { %v62_v44 = vxor.u32 %v61_v32, %v60_v29 }
  0x2b   :  { %v349_v18 = vxor.u32 %v71_v16, %v70_v15 }
  0x2c   :  { %v73_v60 = vshrl.u32 %v62_v44, 9 }
  0x2d   :  { %v78_v19 = vshrl.u32 %v349_v18, 9 }
  0x2e   :  { %v74_v9 = vor.u32 1065353216, %v73_v60 }
  0x2f   :  { %v79_v21 = vor.u32 1065353216, %v78_v19 }
  0x30   :  { %v236_v17 = vadd.f32 -1.0, %v74_v9 }
  0x31   :  { %v237_v22 = vadd.f32 -1.0, %v79_v21 }
  0x33   :  { %v352_v24 = vmul.f32 6.2831855, %v237_v22  ;;  %v77_v22 = vmax.f32 %v236_v17, 1e-07 }
  0x35   :  { %v97_v25 = vand.u32 2139095040, %v352_v24  ;;  %v94_v30 = vand.u32 2147483647, %v352_v24  ;;  %257 = vlog2.f32 %v77_v22  ;;  %vm96_vm7 = vcmp.lt.s32.totalorder %v352_v24, 0 }
  0x36   :  { %vm186_vm14 = vweird.f32 %v352_v24 }
  0x37   :  { %v98_v27 = vshrl.u32 %v97_v25, 23  ;;  %v101_v33 = vand.u32 8388607, %v94_v30  ;;  %vm95_vm8 = vcmp.le.f32.partialorder %v94_v30, 0.7853982 }
  0x39   :  { %v238_v28 = vadd.s32 4294967169, %v98_v27  ;;  %v102_v45 = vor.u32 8388608, %v101_v33 }
  0x3b   :  { %v104_v31 = vadd.s32 1, %v238_v28  ;;  %v142_v61 = vshll.u32 %v102_v45, 8 }
  0x3d   :  { %vm105_vm0 = vcmp.gt.s32.totalorder %v104_v31, 0 }
  0x3e   :  { %v106_v34 = vsel %vm105_vm0, %v104_v31, 0 }
  0x3f   :  { %v108_v35 = vand.u32 31, %v106_v34  ;;  %v107_v36 = vshrl.u32 %v106_v34, 5 }
  0x41   :  { %v109_v37 = vsub.s32 32, %v108_v35  ;;  %v111_v39 = vshll.u32 %v314_v38, %v108_v35  ;;  %v114_v41 = vshll.u32 %v315_v40, %v108_v35  ;;  %v117_v43 = vshll.u32 %v316_v42, %v108_v35 }
  0x42   :  { %v120_v47 = vshll.u32 %v317_v46, %v108_v35  ;;  %v123_v52 = vshll.u32 %v318_v51, %v108_v35  ;;  %vm126_vm1 = vcmp.lt.s32.totalorder %v107_v36, 1  ;;  %vm127_vm2 = vcmp.lt.s32.totalorder %v107_v36, 2  ;;  %v258_v34 = vpop.eup %257 }
  0x43   :  { %v112_v48 = vshrl.u32 %v315_v40, %v109_v37  ;;  %v115_v49 = vshrl.u32 %v316_v42, %v109_v37  ;;  %v118_v50 = vshrl.u32 %v317_v46, %v109_v37  ;;  %v110_v53 = vshrl.u32 %v314_v38, %v109_v37 }
  0x44   :  { %v121_v54 = vshrl.u32 %v318_v51, %v109_v37  ;;  %v124_v56 = vshrl.u32 %v319_v55, %v109_v37  ;;  %vm128_vm3 = vcmp.lt.s32.totalorder %v107_v36, 3  ;;  %vm129_vm4 = vcmp.lt.s32.totalorder %v107_v36, 4 }
  0x45   :  { %v113_v57 = vor.u32 %v112_v48, %v111_v39  ;;  %v116_v58 = vor.u32 %v115_v49, %v114_v41  ;;  %v119_v59 = vor.u32 %v118_v50, %v117_v43  ;;  %v83_v37 = vmul.f32 0.6931472, %v258_v34 }
  0x46   :  { %v122_v62 = vor.u32 %v121_v54, %v120_v47  ;;  %v125_v63 = vor.u32 %v124_v56, %v123_v52 }
  0x47   :  { %v130_v0 = vsel %vm126_vm1, %v110_v53, %v113_v57  ;;  %v131_v1 = vsel %vm129_vm4, %v119_v59, 2102212464  ;;  %v134_v2 = vsel %vm126_vm1, %v113_v57, %v116_v58  ;;  %v138_v3 = vsel %vm126_vm1, %v116_v58, %v119_v59 }
  0x48   :  { %v132_v4 = vsel %vm128_vm3, %v116_v58, %v131_v1  ;;  %v135_v5 = vsel %vm129_vm4, %v122_v62, 920167782  ;;  %v139_v6 = vsel %vm129_vm4, %v125_v63, 1326507024  ;;  %v84_v43 = vmul.f32 -2.0, %v83_v37 }
  0x49   :  { %v136_v7 = vsel %vm128_vm3, %v119_v59, %v135_v5  ;;  %v140_v8 = vsel %vm128_vm3, %v122_v62, %v139_v6  ;;  %v133_v10 = vsel %vm127_vm2, %v130_v0, %v132_v4  ;;  %v213_v6 = vld [vmem:[#allocation4] sm:$0xff] }
  0x4a   :  { %v137_v11 = vsel %vm127_vm2, %v134_v2, %v136_v7  ;;  %v141_v12 = vsel %vm127_vm2, %v138_v3, %v140_v8  ;;  %v149_v19 = vmul.u32 %v142_v61, %v133_v10  ;;  %259 = vrsqrt.f32 %v84_v43 }
  0x4b   :  { %v361_v13 = vmul.u32.u64.low %v142_v61, %v141_v12  ;;  %v362_v14 = vmul.u32.u64.high %v142_v61, %v141_v12, %v361_v13  ;;  %v364_v15 = vmul.u32.u64.low %v142_v61, %v137_v11  ;;  %v365_v16 = vmul.u32.u64.high %v142_v61, %v137_v11, %v364_v15 }
  0x4c   :  { %vm87_vm9 = vcmp.eq.f32.partialorder %v84_v43, inf  ;;  %v90_v59 = vand.u32 2147483648, %v84_v43  ;;  %vm89_vm10 = vcmp.eq.f32.partialorder %v84_v43, 0.0  ;;  %v207_v12 = vand.u32 1, %v349_v18 }
  0x4d   :  { %vm151_vm5 = vc.u32 %v362_v14, %v364_v15  ;;  %v152_v20 = vadd.s32 1, %v365_v16  ;;  %v150_v35 = vadd.s32 %v364_v15, %v362_v14  ;;  %v320_v13 = vmov -1.0  }
  0x4e   :  { %vm208_vm15 = vcmp.eq.s32.totalorder %v207_v12, 0 }
  0x4f   :  { %v153_v21 = vsel %vm151_vm5, %v152_v20, %v365_v16  ;;  %v209_v14 = vsel %vm208_vm15, 1.0, %v320_v13 }
  0x50   :  { %v154_v23 = vadd.s32 %v153_v21, %v149_v19  ;;  %v216_v21 = vld [vmem:[#allocation4 + $0x8] sm:$0xff] }
  0x52   :  { %v155_v25 = vadd.s32 536870912, %v154_v23 }
  0x54   :  { %v156_v26 = vshrl.u32 %v155_v25, 30 }
  0x56   :  { %v157_v27 = vshll.u32 %v156_v26, 30  ;;  %v180_v52 = vsub.s32 4, %v156_v26 }
  0x57   :  { %v260_v55 = vpop.eup %259 }
  0x58   :  { %v158_v28 = vsub.s32 %v154_v23, %v157_v27  ;;  %v181_v54 = vsel %vm96_vm7, %v180_v52, %v156_v26  ;;  %v86_v57 = vmul.f32 %v260_v55, %v84_v43 }
  0x59   :  { %v183_v56 = vsel %vm95_vm8, 0, %v181_v54 }
  0x5a   :  { %v160_v29 = vsub.s32 0, %v158_v28  ;;  %v187_v58 = vand.u32 3, %v183_v56  ;;  %v88_v60 = vsel %vm87_vm9, %v84_v43, %v86_v57 }
  0x5b   :  { %v91_v63 = vsel %vm89_vm10, %v90_v59, %v88_v60 }
  0x5c   :  { %v239_v31 = vmin.u32 %v160_v29, %v158_v28  ;;  %vm192_vm11 = vcmp.eq.s32.totalorder %v187_v58, 2  ;;  %vm189_vm12 = vcmp.eq.s32.totalorder %v187_v58, 0  ;;  %vm188_vm13 = vcmp.lt.s32.totalorder %v187_v58, 2 }
  0x5d   :  { %v92_v3 = vmul.f32 0.1, %v91_v63 }
  0x5e   :  { %v162_v32 = vclz %v239_v31 }
  0x5f   :  { %v211_v17 = vmul.f32 %v209_v14, %v92_v3 }
  0x60   :  { %v240_v33 = vadd.s32 4294967294, %v162_v32 }
  0x62   :  { %vm241_vm6 = vcmp.lt.s32.totalorder %v240_v33, 0 }
  0x63   :  { %v165_v36 = vsel %vm241_vm6, 0, %v240_v33 }
  0x64   :  { %v166_v38 = vsub.s32 32, %v165_v36  ;;  %v167_v39 = vshll.u32 %v158_v28, %v165_v36  ;;  %v170_v40 = vsub.s32 4294967266, %v165_v36 }
  0x66   :  { %v168_v41 = vshrl.u32 %v150_v35, %v166_v38  ;;  %v171_v42 = vadd.s32 127, %v170_v40 }
  0x68   :  { %v169_v44 = vor.u32 %v168_v41, %v167_v39  ;;  %v172_v45 = vshll.u32 %v171_v42, 23 }
  0x6a   :  { %v173_v46 = vor.u32 4788187, %v172_v45  ;;  %v176_v47 = vcvt.s32.f32 %v169_v44 }
  0x6c   :  { %v174_v48 = vand.u32 2147483647, %v173_v46 }
  0x6e   :  { %v177_v49 = vmul.f32 %v176_v47, %v174_v48 }
  0x70   :  { %v178_v50 = vxor.u32 2147483648, %v177_v49 }
  0x72   :  { %v179_v51 = vsel %vm96_vm7, %v178_v50, %v177_v49 }
  0x73   :  { %v182_v53 = vsel %vm95_vm8, %v352_v24, %v179_v51 }
  0x74   :  { %261 = vcosq.f32 %v182_v53 }
  0x75   :  { %263 = vsinq.f32 %v182_v53 }
  0x81   :  { %v262_v61 = vpop.eup %261 }
  0x82   :  { %v264_v62 = vpop.eup %263  ;;  %v193_v30 = vxor.u32 2147483648, %v262_v61 }
  0x83   :  { %v190_v0 = vxor.u32 2147483648, %v264_v62 }
  0x84   :  { %v194_v1 = vsel %vm192_vm11, %v193_v30, %v264_v62 }
  0x85   :  { %v191_v2 = vsel %vm189_vm12, %v262_v61, %v190_v0 }
  0x86   :  { %v195_v4 = vsel %vm188_vm13, %v191_v2, %v194_v1 }
  0x87   :  { %v196_v5 = vsel %vm186_vm14, nan, %v195_v4 }
  0x88   :  { %v197_v7 = vmul.f32 %v196_v5, %v196_v5  ;;  %v210_v8 = vmul.f32 %v196_v5, %v92_v3 }
  0x8a   :  { %v198_v9 = vsub.f32 1.0, %v197_v7  ;;  %v214_v10 = vadd.f32 %v213_v6, %v210_v8 }
  0x8c   :  { %v199_v11 = vmax.f32 %v198_v9, 0.0  ;;  %215 = vst [vmem:[#allocation7] sm:$0xff] %v214_v10 }
  0x8e   :  { %265 = vrsqrt.f32 %v199_v11  ;;  %vm202_vm0 = vcmp.eq.f32.partialorder %v199_v11, inf  ;;  %v205_v24 = vand.u32 2147483648, %v199_v11  ;;  %vm204_vm1 = vcmp.eq.f32.partialorder %v199_v11, 0.0 }
  0x9b   :  { %v266_v15 = vpop.eup %265 }
  0x9c   :  { %v201_v16 = vmul.f32 %v266_v15, %v199_v11 }
  0x9e   :  { %v203_v19 = vsel %vm202_vm0, %v199_v11, %v201_v16 }
  0x9f   :  { %v206_v20 = vsel %vm204_vm1, %v205_v24, %v203_v19 }
  0xa0   :  { %v212_v22 = vmul.f32 %v211_v17, %v206_v20 }
  0xa2   :  { %v217_v23 = vadd.f32 %v216_v21, %v212_v22 }
  0xa4   :  { %218 = vst [vmem:[#allocation7 + $0x8] sm:$0xff] %v217_v23 }
  0xa5   :  { %298 = shalt.err (!%p295_p9)
}
  0xa6   :  { %230 = dma.vmem_to_hbm [thread:$0]  %s225_s9, 256, %s385_s2, [#allocation6], %s312_s12, %s312_s12, %s313_s13  }
  0xa7   :  { %309 = dma.done.wait [#allocation6], 256  }
  0xa8   :  { %310 = vsyncadd [#allocation6], 4294967040 }
  0xa9   :  { %234 = vsyncpa [#allocation5], 1 }
  0xaa   :  { %235 = vsyncpa [#allocation6], 1 }

</bundles_post_ra>
